<compile_context>
chip_gen: v7x
topology: tpu7x:2x2x1
jax: 0.10.0
libtpu: 0.0.40
codegen_flags: <defaults>
</compile_context>

<pallas_src>
import functools

import jax
import jax.numpy as jnp
import numpy as np
from jax.experimental import pallas as pl
from jax.experimental.pallas import tpu as pltpu


def _fused_nin_meanbn_kernel(x_ref, w_ref, bias_ref, out_ref, xbar_ref,
                             xsum_ref, *, inv_m):
    """Fused NIN matmul + mean-only BN.

    x_ref:    [1, C_in, tile_s]   input block (NCHW, spatial flattened)
    w_ref:    [C_out, C_in]       NIN weight (resident)
    bias_ref: [C_out, 1]          BN bias (resident)
    out_ref:  [1, C_out, tile_s]  output block (NCHW, spatial flattened)
    xbar_ref: [C_in, 1]           exported per-input-channel mean of x
    xsum_ref: [C_in, 1]           VMEM scratch accumulator
    """
    phase = pl.program_id(0)
    first_tile = jnp.logical_and(pl.program_id(1) == 0, pl.program_id(2) == 0)

    # ---- phase 0: accumulate per-input-channel sum of x. -------------------
    @pl.when(jnp.logical_and(phase == 0, first_tile))
    def _():
        xsum_ref[...] = jnp.zeros_like(xsum_ref)

    @pl.when(phase == 0)
    def _():
        xsum_ref[...] += jnp.sum(x_ref[0], axis=-1, keepdims=True)

    # ---- phase-1 prologue (runs once): sum -> mean, export it. -------------
    @pl.when(jnp.logical_and(phase == 1, first_tile))
    def _():
        xsum_ref[...] = xsum_ref[...] * inv_m      # now holds mean(x) per C_in
        xbar_ref[...] = xsum_ref[...]

    # ---- phase 1: y = W @ (x - mean(x)) + bias, written natively in NCHW. --
    @pl.when(phase == 1)
    def _():
        xc = x_ref[0] - xsum_ref[...]              # [C_in, tile_s] lane-bcast
        y = jnp.dot(w_ref[...], xc, preferred_element_type=jnp.float32)
        out_ref[0] = (y + bias_ref[...]).astype(out_ref.dtype)


def _choose_spatial_tile(S, C_in, C_out, vmem_budget_bytes=8 * 1024 * 1024):
    """Largest spatial tile that divides S (or equals S) and keeps the
    double-buffered x + out working set under a conservative VMEM budget."""
    def pad8(c):
        return max(8, ((c + 7) // 8) * 8)
    # 2 operand streams (x, out), double-buffered, f32.
    bytes_per_lane = 2 * 2 * 4 * (pad8(C_in) + pad8(C_out))
    cap = max(128, (vmem_budget_bytes // bytes_per_lane) // 128 * 128)
    if S <= cap:
        return S                                   # full spatial dim per block
    t = cap
    while t >= 128:
        if S % t == 0:
            return t
        t -= 128
    # TODO(synk): mask partial spatial tiles instead of falling back to full S.
    return S


def mean_only_bn_nin_forward(x, weight, bn_bias, avg_batch_mean, *, tile_s=None):
    """Training-mode forward of MeanOnlyBatchNormLayer wrapping a NINLayer.

    x:              [N, C_in, H, W]  (NCHW)
    weight:         [C_out, C_in]    NINLayer weight (root bias was deleted)
    bn_bias:        [C_out]          MeanOnlyBatchNormLayer bias
    avg_batch_mean: [C_out]          running-mean buffer

    Returns (out [N, C_out, H, W], new_avg_batch_mean [C_out]).
    """
    N, C_in, H, W = x.shape
    C_out = weight.shape[0]
    S = H * W
    M = N * S

    if tile_s is None:
        tile_s = _choose_spatial_tile(S, C_in, C_out)

    x3 = x.reshape(N, C_in, S).astype(jnp.float32)         # free view (no transpose)
    w = weight.astype(jnp.float32)                         # [C_out, C_in]
    bias2d = bn_bias.reshape(C_out, 1).astype(jnp.float32)

    grid = (2, N, S // tile_s)                             # (phase, batch, spatial)

    out3, xbar = pl.pallas_call(
        functools.partial(_fused_nin_meanbn_kernel, inv_m=1.0 / M),
        out_shape=(
            jax.ShapeDtypeStruct((N, C_out, S), jnp.float32),
            jax.ShapeDtypeStruct((C_in, 1), jnp.float32),
        ),
        grid_spec=pltpu.PrefetchScalarGridSpec(
            num_scalar_prefetch=0,
            grid=grid,
            in_specs=[
                pl.BlockSpec((1, C_in, tile_s), lambda p, n, s: (n, 0, s)),
                pl.BlockSpec((C_out, C_in), lambda p, n, s: (0, 0)),
                pl.BlockSpec((C_out, 1), lambda p, n, s: (0, 0)),
            ],
            out_specs=[
                # Phase 0 never writes: pin the block to (0,0,0) so no garbage
                # writebacks happen; phase 1 sweeps every (n, s) block once.
                pl.BlockSpec((1, C_out, tile_s), lambda p, n, s: (n * p, 0, s * p)),
                pl.BlockSpec((C_in, 1), lambda p, n, s: (0, 0)),
            ],
            scratch_shapes=[pltpu.VMEM((C_in, 1), jnp.float32)],
        ),
        compiler_params=pltpu.CompilerParams(
            dimension_semantics=("arbitrary", "arbitrary", "arbitrary")),
        cost_estimate=pl.CostEstimate(
            flops=2 * M * C_in * C_out + M * C_in,
            transcendentals=0,
            bytes_accessed=4 * (2 * M * C_in + M * C_out
                                + C_out * C_in + C_out + C_in),
        ),
    )(x3, w, bias2d)

    # Glue: running-mean update (mean(W@x) == W @ mean(x), NIN bias deleted).
    mu = (w @ xbar)[:, 0]                                  # [C_out]
    new_avg = 0.9 * avg_batch_mean + 0.1 * mu
    out = out3.reshape(N, C_out, H, W)                     # free view
    return out, new_avg


if __name__ == "__main__":
    N, C_in, C_out, H, W = 2, 4, 8, 16, 16

    key = jax.random.PRNGKey(0)
    k_x, k_w = jax.random.split(key)

    # Xavier-uniform init of the NINLayer weight (as in _init_weights).
    bound = float(np.sqrt(6.0 / (C_in + C_out)))
    weight = jax.random.uniform(k_w, (C_out, C_in), jnp.float32, -bound, bound)
    # MeanOnlyBatchNormLayer params/buffers: zeros (per __init__).
    bn_bias = jnp.zeros((C_out,), jnp.float32)
    avg_batch_mean = jnp.zeros((C_out,), jnp.float32)

    x = jax.random.normal(k_x, (N, C_in, H, W), jnp.float32)

    out, new_avg = mean_only_bn_nin_forward(x, weight, bn_bias, avg_batch_mean)
    out = jax.block_until_ready(out)
    new_avg = jax.block_until_ready(new_avg)

    # Pure-JAX reference of the PyTorch forward (training mode).
    act = jnp.einsum("oi,nihw->nohw", weight, x)
    mu_ref = act.transpose(1, 0, 2, 3).reshape(C_out, -1).mean(axis=-1)
    ref = act - mu_ref[None, :, None, None] + bn_bias[None, :, None, None]
    ref_avg = 0.9 * avg_batch_mean + 0.1 * mu_ref

    assert out.shape == (N, C_out, H, W)
    np.testing.assert_allclose(np.asarray(out), np.asarray(ref),
                               rtol=1e-5, atol=1e-4)
    np.testing.assert_allclose(np.asarray(new_avg), np.asarray(ref_avg),
                               rtol=1e-5, atol=2e-5)

    print("KERNEL_OK")
</pallas_src>

<mosaic_0001>
module attributes {stable_mosaic.version = 11 : i64} {
  func.func @_fused_nin_meanbn_kernel(%arg0: i32, %arg1: i32, %arg2: i32, %arg3: memref<1x4x256xf32, #tpu.memory_space<vmem>>, %arg4: memref<8x4xf32, #tpu.memory_space<vmem>>, %arg5: memref<8x1xf32, #tpu.memory_space<vmem>>, %arg6: memref<1x8x256xf32, #tpu.memory_space<vmem>>, %arg7: memref<4x1xf32, #tpu.memory_space<vmem>>, %arg8: memref<4x1xf32, #tpu.memory_space<vmem>>) attributes {dimension_semantics = [#tpu.dimension_semantics<arbitrary>, #tpu.dimension_semantics<arbitrary>, #tpu.dimension_semantics<arbitrary>], iteration_bounds = array<i64: 2, 2, 1>, scalar_prefetch = 0 : i64, scratch_operands = 1 : i64, tpu.core_type = #tpu.core_type<tc>, window_params = [{transform_indices = @transform_0, window_bounds = array<i64: 1, 4, 256>}, {pipeline_mode = #tpu.pipeline_mode<synchronous>, transform_indices = @transform_1, window_bounds = array<i64: 8, 4>}, {pipeline_mode = #tpu.pipeline_mode<synchronous>, transform_indices = @transform_2, window_bounds = array<i64: 8, 1>}, {transform_indices = @transform_3, window_bounds = array<i64: 1, 8, 256>}, {pipeline_mode = #tpu.pipeline_mode<synchronous>, transform_indices = @transform_4, window_bounds = array<i64: 4, 1>}]} {
    %c0_i32 = arith.constant 0 : i32
    %0 = arith.cmpi eq, %arg1, %c0_i32 : i32
    %c0_i32_0 = arith.constant 0 : i32
    %1 = arith.cmpi eq, %arg2, %c0_i32_0 : i32
    %2 = arith.andi %0, %1 : i1
    %c0_i32_1 = arith.constant 0 : i32
    %3 = arith.cmpi eq, %arg0, %c0_i32_1 : i32
    %4 = arith.andi %3, %2 : i1
    %5 = arith.extui %4 : i1 to i32
    %c0_i32_2 = arith.constant 0 : i32
    %6 = arith.cmpi ne, %5, %c0_i32_2 : i32
    scf.if %6 {
      %cst = arith.constant 0.000000e+00 : f32
      %17 = vector.broadcast %cst : f32 to vector<4x1xf32>
      %c0 = arith.constant 0 : index
      %c0_8 = arith.constant 0 : index
      %18 = vector.load %arg8[%c0, %c0_8] : memref<4x1xf32, #tpu.memory_space<vmem>>, vector<4x1xf32>
      tpu.vector_store %arg8[%c0, %c0_8], %17 {strides = array<i32>} : memref<4x1xf32, #tpu.memory_space<vmem>>, vector<4x1xf32>,
    } else {
    }
    %c0_i32_3 = arith.constant 0 : i32
    %7 = arith.cmpi eq, %arg0, %c0_i32_3 : i32
    %8 = arith.extui %7 : i1 to i32
    %c0_i32_4 = arith.constant 0 : i32
    %9 = arith.cmpi ne, %8, %c0_i32_4 : i32
    scf.if %9 {
      %c0 = arith.constant 0 : index
      %c0_8 = arith.constant 0 : index
      %17 = vector.load %arg8[%c0, %c0_8] : memref<4x1xf32, #tpu.memory_space<vmem>>, vector<4x1xf32>
      %c0_9 = arith.constant 0 : index
      %c0_10 = arith.constant 0 : index
      %c0_11 = arith.constant 0 : index
      %18 = vector.load %arg3[%c0_9, %c0_10, %c0_11] : memref<1x4x256xf32, #tpu.memory_space<vmem>>, vector<1x4x256xf32>
      %19 = vector.shape_cast %18 : vector<1x4x256xf32> to vector<4x256xf32>
      %cst = arith.constant dense<0.000000e+00> : vector<4xf32>
      %20 = vector.multi_reduction <add>, %19, %cst [1] : vector<4x256xf32> to vector<4xf32>
      %21 = vector.shape_cast %20 : vector<4xf32> to vector<4x1xf32>
      %22 = arith.addf %17, %21 : vector<4x1xf32>
      %c0_12 = arith.constant 0 : index
      %c0_13 = arith.constant 0 : index
      %23 = vector.load %arg8[%c0_12, %c0_13] : memref<4x1xf32, #tpu.memory_space<vmem>>, vector<4x1xf32>
      tpu.vector_store %arg8[%c0_12, %c0_13], %22 {strides = array<i32>} : memref<4x1xf32, #tpu.memory_space<vmem>>, vector<4x1xf32>,
    } else {
    }
    %c1_i32 = arith.constant 1 : i32
    %10 = arith.cmpi eq, %arg0, %c1_i32 : i32
    %11 = arith.andi %10, %2 : i1
    %12 = arith.extui %11 : i1 to i32
    %c0_i32_5 = arith.constant 0 : i32
    %13 = arith.cmpi ne, %12, %c0_i32_5 : i32
    scf.if %13 {
      %c0 = arith.constant 0 : index
      %c0_8 = arith.constant 0 : index
      %17 = vector.load %arg8[%c0, %c0_8] : memref<4x1xf32, #tpu.memory_space<vmem>>, vector<4x1xf32>
      %cst = arith.constant 0.001953125 : f32
      %18 = vector.broadcast %cst : f32 to vector<4x1xf32>
      %19 = arith.mulf %17, %18 : vector<4x1xf32>
      %c0_9 = arith.constant 0 : index
      %c0_10 = arith.constant 0 : index
      %20 = vector.load %arg8[%c0_9, %c0_10] : memref<4x1xf32, #tpu.memory_space<vmem>>, vector<4x1xf32>
      tpu.vector_store %arg8[%c0_9, %c0_10], %19 {strides = array<i32>} : memref<4x1xf32, #tpu.memory_space<vmem>>, vector<4x1xf32>,
      %c0_11 = arith.constant 0 : index
      %c0_12 = arith.constant 0 : index
      %21 = vector.load %arg8[%c0_11, %c0_12] : memref<4x1xf32, #tpu.memory_space<vmem>>, vector<4x1xf32>
      %c0_13 = arith.constant 0 : index
      %c0_14 = arith.constant 0 : index
      %22 = vector.load %arg7[%c0_13, %c0_14] : memref<4x1xf32, #tpu.memory_space<vmem>>, vector<4x1xf32>
      tpu.vector_store %arg7[%c0_13, %c0_14], %21 {strides = array<i32>} : memref<4x1xf32, #tpu.memory_space<vmem>>, vector<4x1xf32>,
    } else {
    }
    %c1_i32_6 = arith.constant 1 : i32
    %14 = arith.cmpi eq, %arg0, %c1_i32_6 : i32
    %15 = arith.extui %14 : i1 to i32
    %c0_i32_7 = arith.constant 0 : i32
    %16 = arith.cmpi ne, %15, %c0_i32_7 : i32
    scf.if %16 {
      %c0 = arith.constant 0 : index
      %c0_8 = arith.constant 0 : index
      %c0_9 = arith.constant 0 : index
      %17 = vector.load %arg3[%c0, %c0_8, %c0_9] : memref<1x4x256xf32, #tpu.memory_space<vmem>>, vector<1x4x256xf32>
      %18 = vector.shape_cast %17 : vector<1x4x256xf32> to vector<4x256xf32>
      %c0_10 = arith.constant 0 : index
      %c0_11 = arith.constant 0 : index
      %19 = vector.load %arg8[%c0_10, %c0_11] : memref<4x1xf32, #tpu.memory_space<vmem>>, vector<4x1xf32>
      %20 = vector.broadcast %19 : vector<4x1xf32> to vector<4x256xf32>
      %21 = arith.subf %18, %20 : vector<4x256xf32>
      %c0_12 = arith.constant 0 : index
      %c0_13 = arith.constant 0 : index
      %22 = vector.load %arg4[%c0_12, %c0_13] : memref<8x4xf32, #tpu.memory_space<vmem>>, vector<8x4xf32>
      %cst = arith.constant dense<0.000000e+00> : vector<8x256xf32>
      %23 = tpu.matmul %22, %21, %cst {dimension_numbers = #tpu.dot_dimension_numbers<[1], [0], [0], [1], [0, 0, 1, 1], [], []>} : vector<8x4xf32>, vector<4x256xf32>, vector<8x256xf32> -> vector<8x256xf32>
      %c0_14 = arith.constant 0 : index
      %c0_15 = arith.constant 0 : index
      %24 = vector.load %arg5[%c0_14, %c0_15] : memref<8x1xf32, #tpu.memory_space<vmem>>, vector<8x1xf32>
      %25 = vector.broadcast %24 : vector<8x1xf32> to vector<8x256xf32>
      %26 = arith.addf %23, %25 : vector<8x256xf32>
      %c0_16 = arith.constant 0 : index
      %c0_17 = arith.constant 0 : index
      %c0_18 = arith.constant 0 : index
      %27 = vector.load %arg6[%c0_16, %c0_17, %c0_18] : memref<1x8x256xf32, #tpu.memory_space<vmem>>, vector<1x8x256xf32>
      %28 = vector.shape_cast %27 : vector<1x8x256xf32> to vector<8x256xf32>
      %29 = vector.shape_cast %26 : vector<8x256xf32> to vector<1x8x256xf32>
      tpu.vector_store %arg6[%c0_16, %c0_17, %c0_18], %29 {strides = array<i32>} : memref<1x8x256xf32, #tpu.memory_space<vmem>>, vector<1x8x256xf32>,
    } else {
    }
    return
  }
  func.func @transform_0(%arg0: i32, %arg1: i32, %arg2: i32) -> (i32, i32, i32) {
    %c0_i32 = arith.constant 0 : i32
    %c0_i32_0 = arith.constant 0 : i32
    return %arg1, %c0_i32, %arg2 : i32, i32, i32
  }
  func.func @transform_1(%arg0: i32, %arg1: i32, %arg2: i32) -> (i32, i32) {
    %c0_i32 = arith.constant 0 : i32
    %c0_i32_0 = arith.constant 0 : i32
    %c0_i32_1 = arith.constant 0 : i32
    return %c0_i32, %c0_i32_0 : i32, i32
  }
  func.func @transform_2(%arg0: i32, %arg1: i32, %arg2: i32) -> (i32, i32) {
    %c0_i32 = arith.constant 0 : i32
    %c0_i32_0 = arith.constant 0 : i32
    %c0_i32_1 = arith.constant 0 : i32
    return %c0_i32, %c0_i32_0 : i32, i32
  }
  func.func @transform_3(%arg0: i32, %arg1: i32, %arg2: i32) -> (i32, i32, i32) {
    %0 = arith.muli %arg1, %arg0 : i32
    %1 = arith.muli %arg2, %arg0 : i32
    %c0_i32 = arith.constant 0 : i32
    %c0_i32_0 = arith.constant 0 : i32
    return %0, %c0_i32, %1 : i32, i32, i32
  }
  func.func @transform_4(%arg0: i32, %arg1: i32, %arg2: i32) -> (i32, i32) {
    %c0_i32 = arith.constant 0 : i32
    %c0_i32_0 = arith.constant 0 : i32
    %c0_i32_1 = arith.constant 0 : i32
    return %c0_i32, %c0_i32_0 : i32, i32
  }
}

</mosaic_0001>

<bundles_post_ra>
// kernel: tpu_custom_call.1
= control target key start
LH: loop header
LB: loop body
LE: loop exit
PB: predicated region body
PF: predicated region fallthrough
CT: control target
= control target key end

     0   :  { %10 = vsyncpa [#allocation4], 0  ;;  %s877_s0 = inlined_call_operand.vmem [shape: f32[2,4,256], index: 0, kind: input, shape index: {}]   ;;  %s878_s1 = inlined_call_operand.vmem [shape: f32[8,4], index: 1, kind: input, shape index: {}]   ;;  %s879_s2 = inlined_call_operand.vmem [shape: f32[8,1], index: 2, kind: input, shape index: {}]   ;;  %s880_s3 = inlined_call_operand.hbm [shape: f32[2,8,256], index: 3, kind: output, shape index: {0}]   ;;  %s881_s4 = inlined_call_operand.vmem [shape: f32[4,1], index: 4, kind: output, shape index: {1}]  }
   0x1   :  { %12 = vsyncpa [#allocation4 + $0x1], 0  ;;  %s718_s15 = smov 0   ;;  %s720_s16 = smov 0  }
   0x2   :  { %s722_s17 = smov 0   ;;  %s724_s18 = smov 0  }
   0x3   :  { %s726_s19 = smov 0   ;;  %s728_s20 = smov 0  }
   0x4   :  { %s730_s21 = smov 0   ;;  %s732_s22 = smov 0  }
   0x5 LB: > { %s493_s23 = sadd.s32 4294967295, %s686_s22   ;;  %s494_s24 = sadd.s32 4294967294, %s686_s22   ;;  %s686_s22 = sphi %s732_s22, %s18_s22   ;;  %s682_s21 = sphi %s730_s21, %s890_s21   ;;  %s678_s20 = sphi %s728_s20, %s889_s20   ;;  %s674_s19 = sphi %s726_s19, %s888_s19   ;;  %s670_s18 = sphi %s724_s18, %s887_s18   ;;  %s666_s17 = sphi %s722_s17, %s886_s17   ;;  %s662_s16 = sphi %s720_s16, %s885_s16   ;;  %s658_s15 = sphi %s718_s15, %s884_s15  }
   0x6   : > { %s33_s25 = sadd.s32 1, %s678_s20  ;;  %s37_s26 = sadd.s32 1, %s682_s21 }
   0x7   : > { %p35_p0 = scmp.ge.s32.totalorder %s33_s25, 2  ;;  %s111_s27 = smul.u32 %s678_s20, %s682_s21 }
   0x8   : > { %p130_p1 = scmp.ne.s32.totalorder %s666_s17, %s662_s16  ;;  %p131_p2 = scmp.eq.s32.totalorder %s493_s23, 3 }
   0x9   : > { %s892_s25 = smov (%p35_p0, %s33_s25), 0  ;;  %s894_s26 = smov (!%p35_p0, %s37_s26), %s682_s21 }
   0xa   : > { %p136_p3 = scmp.ne.s32.totalorder %s662_s16, %s658_s15  ;;  %p39_p4 = scmp.ge.s32.totalorder %s894_s26, 2 }
   0xb   : > { %p137_p5 = scmp.eq.s32.totalorder %s494_s24, 3  ;;  %p771_p6 = por %p131_p2, %p130_p1 }
   0xc   : > { %p497_p7 = scmp.ge.s32.totalorder %s686_s22, 1  ;;  %s896_s26 = smov (%p39_p4, %s894_s26), 0 }
   0xd   : > { %p778_p8 = por %p137_p5, %p136_p3  ;;  %p195_p9 = scmp.lt.s32.totalorder %s686_s22, 5 }
   0xe   : > { %s113_s30 = smul.u32 %s896_s26, %s892_s25  ;;  %s120_s6 = sadd.s32 1, %s666_s17 }
   0xf   : > { %p196_p10 = pnand %p497_p7, %p195_p9 }
  0x10   : > { %s115_s5 = ssub.s32 %s111_s27, %s113_s30  ;;  %s220_s8 = sand.u32 (!%p196_p10), 1, %s662_s16  }
  0x11   : > { %p118_p11 = scmp.eq.s32.totalorder %s115_s5, 0  ;;  %199 = sbr.rel (%p196_p10) target bundleno = 585 (0x249), region = 32 }
  0x12   : > { %p226_p12 = scmp.lt.s32.totalorder (!%p196_p10), %s670_s18, 1  ;;  %s498_s9 = sshll.u32 (!%p196_p10), %s220_s8, 4 }
  0x13   : > { %s787_s7 = scalar_select %p118_p11, %s666_s17, %s120_s6  }
  0x14   : > { %p238_p13 = scmp.eq.s32.totalorder (!%p196_p10), %s670_s18, 0  ;;  %p242_p0 = scmp.eq.s32.totalorder (!%p196_p10), %s674_s19, 0 }
  0x15   : > { %s803_s23 = scalar_lea.vmem (!%p196_p10), [#allocation3], %s498_s9 }
  0x16   : > { %p243_p1 = pnand (!%p196_p10), %p242_p0, %p238_p13 }
  0x18   : > { %s227_s10 = scalar_select %p226_p12, %s670_s18, 1 }
  0x19   : > { %246 = sbr.rel (%p243_p1) target bundleno = 32 (0x20), region = 36  ;;  %vm247_vm0 = vcmask (!%p243_p1), 3072   ;;  %v688_v0 = vmov (!%p243_p1), 0.0  }
  0x1a   : > { %s512_s11 = sshll.u32 %s227_s10, 3  ;;  %248 = vst.msk [vmem:[#allocation2] sm:$0xf] (!%p243_p1), %vm247_vm0, %v688_v0 }
  0x1b   : > { %s801_s14 = scalar_lea.vmem %s877_s0, %s512_s11 }
  0x20 PF: > { %p502_p2 = scmp.ne.s32.totalorder %s674_s19, 0 }
  0x21   : > { %v253_v1 = vld [vmem:[%s801_s14] sm:$0xff] (!%p502_p2)  ;;  %vm257_vm1 = vcmask (!%p502_p2), 1043456   ;;  %vm264_vm2 = vcmask (!%p502_p2), 3072  }
  0x22   : > { %251 = sbr.rel (%p502_p2) target bundleno = 184 (0xb8), region = 40  ;;  %v255_v2 = vcombine.high (!%p502_p2), %v253_v1, %v253_v1  ;;  %v258_v3 = vsel (!%p502_p2), %vm257_vm1, %v253_v1, 0.0  ;;  %v252_v6 = vld [vmem:[#allocation2] sm:$0xf] (!%p502_p2) }
  0x24   : > { %v259_v4 = vsel (!%p502_p2), %vm257_vm1, %v255_v2, 0.0 }
  0x25   : > { %v260_v5 = vadd.f32 (!%p502_p2), %v259_v4, %v258_v3 }
  0x27   : > { %261 = vadd.xlane.f32.xlu0 (!%p502_p2), %v260_v5 }
  0xb4   : > { %v262_v7 = vpop.xlane.xlu0 %261 }
  0xb5   : > { %v263_v8 = vadd.f32 %v262_v7, %v252_v6 }
  0xb7   : > { %265 = vst.msk [vmem:[#allocation2] sm:$0xf] %vm264_vm2, %v263_v8 }
  0xb8 PF: > { %p266_p3 = scmp.eq.s32.totalorder %s674_s19, 1 }
  0xba   : > { %p267_p4 = pnand %p266_p3, %p238_p13 }
  0xbb   : > { %vm273_vm3 = vcmask (!%p267_p4), 3072  }
  0xbc   : > { %270 = sbr.rel (%p267_p4) target bundleno = 202 (0xca), region = 44 }
  0xbe   : > { %v271_v9 = vld [vmem:[#allocation2] sm:$0xf] (!%p267_p4) }
  0xbf   : > { %v272_v10 = vmul.f32 (!%p267_p4), 0.001953125, %v271_v9 }
  0xc1   : > { %274 = vst.msk [vmem:[#allocation2] sm:$0xf] (!%p267_p4), %vm273_vm3, %v272_v10 }
  0xc8   : > { %v275_v11 = vld [vmem:[#allocation2] sm:$0xf] }
  0xc9   : > { %276 = vst.msk [vmem:[%s881_s4] sm:$0xf] %vm273_vm3, %v275_v11 }
  0xca PF: > { %p503_p5 = scmp.ne.s32.totalorder %s674_s19, 1 }
  0xcb   : > { %v689_v13 = vmov (!%p503_p5), 0   ;;  %v296_v14 = vld [vmem:[%s879_s2] sm:$0xff] (!%p503_p5)  ;;  %v690_v15 = vmov (!%p503_p5), 0.0   ;;  %v691_v16 = vmov (!%p503_p5), 839922192   ;;  %v289_v18 = vlaneseq (!%p503_p5) }
  0xcc   : > { %279 = sbr.rel (%p503_p5) target bundleno = 560 (0x230), region = 48  ;;  %591 = vset.pattern.permute.xlu0 (!%p503_p5), %v689_v13  ;;  %377 = vmatprep.mubr.f32.mxu0 (!%p503_p5), %v690_v15  ;;  %v287_v17 = vunpack.c.l.s4 (!%p503_p5), %v691_v16  ;;  %v280_v23 = vld [vmem:[%s801_s14] sm:$0xff] (!%p503_p5)  ;;  %vm308_vm4 = vcmask (!%p503_p5), 1043456   ;;  %vm304_vm5 = vcmask (!%p503_p5), 31744  }
  0xcd   : > { %v290_v20 = vshrl.u32 (!%p503_p5), %v289_v18, 7  ;;  %v295_v27 = vld [vmem:[%s878_s1] sm:$0xff] (!%p503_p5) }
  0xce   : > { %v288_v19 = vunpack.c.0.s8 (!%p503_p5), %v287_v17 }
  0xcf   : > { %v281_v12 = vld [vmem:[#allocation2] sm:$0xf] (!%p503_p5) }
  0xd0   : > { %284 = vperm.xlu0 (!%p503_p5), %591, %v281_v12   ;;  %v291_v21 = vsub.s32 (!%p503_p5), %v288_v19, %v290_v20 }
  0xd4   : > { %299 = vperm.xlu0 %591, %v296_v14  }
 0x14f   : > { %v285_v22 = vpop.permute.xlu0 %284 }
 0x150   : > { %v292_v24 = vrot.slane %v285_v22, %v291_v21 }
 0x152   : > { %v294_v25 = vsub.f32 %v280_v23, %v292_v24 }
 0x153   : > { %v300_v28 = vpop.permute.xlu0 %299 }
 0x154   : > { %v303_v26 = vcombine.high %v294_v25, %v294_v25 }
 0x156   : > { %504 = vmatprep.subr.msk.mxu0 %vm308_vm4, %v303_v26 }
 0x157   : > { %505 = vmatpush1.msk.msra.mxu0 %vm308_vm4, %v294_v25 }
 0x158   : > { %506 = vmatmul.mubr.msk.f32.vlgmr.msra.gmra.mrb[0].mxu0 %vm304_vm5, %v295_v27 }
 0x22b   : > { %v379_v29 = vpop.f32.mrb[0].mxu0 }
 0x22c   : > { %v380_v30 = vadd.f32 %v379_v29, %v300_v28  ;;  %v381_v31 = vpop.f32.mrb[1].mxu0 }
 0x22d   : > { %v382_v32 = vadd.f32 %v381_v31, %v300_v28 }
 0x22e   : > { %384 = vst [vmem:[%s803_s23] sm:$0xff] %v380_v30 }
 0x22f   : > { %385 = vst [vmem:[%s803_s23 + $0x8] sm:$0xff] %v382_v32 }
 0x230 PF: > { %s394_s10 = smul.u32 %s670_s18, %s674_s19  ;;  %s405_s11 = sshll.u32 %s803_s23, 4  ;;  %s826_s11 = int_to_ptr.vmem [resolvable:$true] %s405_s11 }
 0x231   : > { %s387_s27 = scalar_lea.sflag [#allocation4], %s220_s8  ;;  %s592_s30 = scalar_lea.vmem %s826_s11, 256 }
 0x232   : > { %s514_s12 = sshll.u32 %s394_s10, 8  ;;  %p593_p7 = scmp.ne.s32.totalorder %s826_s11, %s592_s30 }
 0x233   : > { %s403_s24 = scalar_lea.hbm %s880_s3, %s514_s12  ;;  %s692_s5 = smov [#allocation3]  }
 0x234   : > { %p594_p9 = pnand %p593_p7, %p771_p6  ;;  %s596_s18 = sshll.u32 %s692_s5, 4  ;;  %s597_s18 = int_to_ptr.vmem [resolvable:$false] %s596_s18 }
 0x235   : > { %s598_s19 = scalar_lea.vmem %s597_s18, 512  ;;  %p599_p11 = scmp.lt.s32.totalorder %s826_s11, %s597_s18 }
 0x236   : > { %p595_p10 = pneg %p594_p9  ;;  %p600_p12 = scmp.lt.s32.totalorder %s598_s19, %s592_s30 }
 0x238   : > { %p601_p13 = por %p600_p12, %p599_p11 }
 0x23a   : > { %p602_p0 = pnand %p601_p13, %p595_p10 }
 0x23c   : > { %605 = shalt.err (!%p602_p0)
}
 0x23d   : > { %s606_s23 = scalar_lea.hbm %s403_s24, 256  ;;  %s610_s9 = scalar_lea.hbm %s880_s3, 512 }
 0x23e   : > { %p607_p1 = scmp.ne.s32.totalorder %s403_s24, %s606_s23  ;;  %p611_p4 = scmp.lt.u32.totalorder %s403_s24, %s880_s3 }
 0x23f   : > { %p612_p5 = scmp.lt.u32.totalorder %s610_s9, %s606_s23  ;;  %p614_p9 = scmp.lt.u32.totalorder %s606_s23, %s403_s24 }
 0x240   : > { %p608_p2 = pnand %p607_p1, %p771_p6 }
 0x241   : > { %p613_p7 = por %p612_p5, %p611_p4 }
 0x242   : > { %p609_p3 = pneg %p608_p2 }
 0x243   : > { %p615_p11 = por %p614_p9, %p613_p7 }
 0x245   : > { %p616_p10 = pnand %p615_p11, %p609_p3 }
 0x247   : > { %619 = shalt.err (!%p616_p10)
}
 0x248   : > { %515 = dma.vmem_to_hbm [thread:$0]  (%p771_p6), %s826_s11, 256, %s403_s24, %s387_s27  }
 0x249 PF: > { %p521_p12 = scmp.ge.s32.totalorder %s686_s22, 2  ;;  %s423_s13 = sand.u32 1, %s658_s15  }
 0x24a   : > { %s424_s14 = scalar_lea.sflag [#allocation4], %s423_s13 }
 0x24b   : > { %p518_p13 = pnand %p521_p12, %p778_p8 }
 0x24d   : > { %653 = dma.done.wait (!%p518_p13), %s424_s14, 256  }
 0x24e   : > { %655 = vsyncadd (!%p518_p13), %s424_s14, 4294967040  ;;  %s18_s22 = sadd.s32 1, %s686_s22   ;;  %s884_s15 = smov %s662_s16 }
 0x24f   : > { %p15_p0 = scmp.ge.s32.totalorder %s18_s22, 6   ;;  %s885_s16 = smov %s666_s17 }
 0x250   : > { %s886_s17 = smov %s787_s7  ;;  %s887_s18 = smov %s678_s20 }
 0x251   : > { %s888_s19 = smov %s682_s21  ;;  %s889_s20 = smov %s892_s25 }
 0x252   : > { %s890_s21 = smov %s896_s26  ;;  %17 = sbr.rel (!%p15_p0) target bundleno = 5 (0x5), region = 91 }
 0x259   :  { %429 = vsyncpa [#allocation4], 1 }
 0x25a   :  { %431 = vsyncpa [#allocation4 + $0x1], 1 }

</bundles_post_ra>
